<compile_context>
chip_gen: v6e
topology: v6e:2x2x1
jax: 0.10.0
libtpu: 0.0.40
codegen_flags: <defaults>
</compile_context>

<pallas_src>
import jax
import jax.numpy as jnp
from jax.experimental import pallas as pl
from jax.experimental.pallas import tpu as pltpu

_IN = 3          # input features  (Linear(3, 9))
_HIDDEN = 9      # hidden units
_LANES = 128     # TPU lane width
_SUBLANES = 8    # TPU sublane count
_MIN_GRID_STEPS = 2   # keep >=2 parallel grid steps for v7x's 2 TensorCores


def _round_up(a, b):
    return (a + b - 1) // b * b


def bpnn_kernel(w1_ref, b1_ref, w2_ref, b2_ref, x_ref, o_ref):
    """One batch tile of  y = relu(x @ W1 + b1) @ W2 + b2  (VPU-only).

    x_ref : (3, TR, 128) VMEM block — features leading, batch on sublane/lane.
    w1/b1/w2/b2 : flat f32 vectors in SMEM (scalar prefetch).
    o_ref : (TR, 128) VMEM block — lane-dense output (unmasked vst).
    """
    x0 = x_ref[0].astype(jnp.float32)   # (TR, 128)
    x1 = x_ref[1].astype(jnp.float32)
    x2 = x_ref[2].astype(jnp.float32)

    # Fully-unrolled 3->9->1 contraction as FMA chains; the y accumulator is
    # carried in vregs and seeded from the j == 0 term (+ output bias).
    # TODO(synk): on v6e/v7x a packed-bf16 hidden-layer variant (f32 y accum)
    # would roughly halve VALU work; kept f32 here for exact parity.
    y = None
    for j in range(_HIDDEN):
        t = x0 * w1_ref[j] + b1_ref[j]               # w1[0, j]
        t = x1 * w1_ref[_HIDDEN + j] + t             # w1[1, j]
        t = x2 * w1_ref[2 * _HIDDEN + j] + t         # w1[2, j]
        term = jnp.maximum(t, 0.0) * w2_ref[j]       # ReLU + layer4 weight
        y = term + b2_ref[0] if j == 0 else term + y
    o_ref[...] = y.astype(o_ref.dtype)


def _flatten_params(w1, b1, w2, b2):
    # w1f[k * 9 + j] = w1[k, j]
    return (w1.astype(jnp.float32).reshape(-1),      # (27,)
            b1.astype(jnp.float32).reshape(-1),      # (9,)
            w2.astype(jnp.float32).reshape(-1),      # (9,)
            b2.astype(jnp.float32).reshape(-1))      # (1,)


def bpnn_forward_blocked(x3, w1, b1, w2, b2, *, tile_rows=2048, out_dtype=None):
    """Fast path: x3 already in batch-on-lanes layout [3, rows, 128].

    Produce activations in this layout upstream to avoid the [N,3]->[3,N]
    strided HBM transpose done by bpnn_forward().  Returns y as [rows, 128].
    """
    assert x3.ndim == 3 and x3.shape[0] == _IN and x3.shape[2] == _LANES
    rows = x3.shape[1]
    out_dtype = out_dtype or x3.dtype

    # Tile height: multiple of 8 sublanes, capped so the parallel grid has at
    # least _MIN_GRID_STEPS steps whenever there is enough work.
    tr = max(_SUBLANES,
             (min(int(tile_rows), _round_up(rows, _SUBLANES))
              // _SUBLANES) * _SUBLANES)
    if rows >= _MIN_GRID_STEPS * _SUBLANES:
        cap = max(_SUBLANES,
                  (rows // _MIN_GRID_STEPS // _SUBLANES) * _SUBLANES)
        tr = min(tr, cap)
    rows_pad = _round_up(rows, tr)
    if rows_pad != rows:
        x3 = jnp.pad(x3, ((0, 0), (0, rows_pad - rows), (0, 0)))

    w1f, b1f, w2f, b2f = _flatten_params(w1, b1, w2, b2)

    # Explicit VMEM budget: double-buffered (3,tr,128) input + (tr,128) output
    # (+ headroom).  Floor of 16 MiB keeps this portable to v5e defaults and
    # well inside v7x's 64 MiB physical VMEM.
    in_bytes = _IN * tr * _LANES * jnp.dtype(x3.dtype).itemsize
    out_bytes = tr * _LANES * jnp.dtype(out_dtype).itemsize
    vmem_limit = max(2 * (in_bytes + out_bytes) + (2 << 20), 16 << 20)

    out = pl.pallas_call(
        bpnn_kernel,
        out_shape=jax.ShapeDtypeStruct((rows_pad, _LANES), out_dtype),
        grid_spec=pltpu.PrefetchScalarGridSpec(
            num_scalar_prefetch=4,                   # w1, b1, w2, b2 -> SMEM
            grid=(rows_pad // tr,),
            in_specs=[
                pl.BlockSpec((_IN, tr, _LANES), lambda i, *_: (0, i, 0)),
            ],
            out_specs=pl.BlockSpec((tr, _LANES), lambda i, *_: (i, 0)),
        ),
        compiler_params=pltpu.CompilerParams(
            dimension_semantics=("parallel",),       # shard batch across TCs
            vmem_limit_bytes=int(vmem_limit),
        ),
    )(w1f, b1f, w2f, b2f, x3)
    return out[:rows] if rows_pad != rows else out


def bpnn_forward(x, w1, b1, w2, b2, *, tile_rows=2048, out_dtype=None):
    """PyTorch-contract path: x [N, 3] -> [N, 1].

    NOTE: the [N,3] -> [3, rows, 128] repack below is a minor-dim-3 strided
    HBM transpose that costs roughly as much as the kernel itself.  When the
    producer can emit activations already blocked, call bpnn_forward_blocked()
    instead.  x's dtype is preserved (bf16 input moves half the HBM bytes).
    """
    n = x.shape[0]
    out_dtype = out_dtype or x.dtype
    rows = -(-n // _LANES)
    n_pad = rows * _LANES
    xt = jnp.pad(x.T, ((0, 0), (0, n_pad - n)))     # [3, n_pad]
    x3 = xt.reshape(_IN, rows, _LANES)
    out = bpnn_forward_blocked(x3, w1, b1, w2, b2,
                               tile_rows=tile_rows, out_dtype=out_dtype)
    return out.reshape(-1)[:n].reshape(n, 1)


def init_params(key):
    """PyTorch default Linear init: U(-1/sqrt(fan_in), 1/sqrt(fan_in))."""
    k1, k2, k3, k4 = jax.random.split(key, 4)
    bound1 = 1.0 / jnp.sqrt(3.0)
    bound2 = 1.0 / jnp.sqrt(9.0)
    # Stored transposed relative to PyTorch so the reference is x @ w1.
    w1 = jax.random.uniform(k1, (3, 9), jnp.float32, -bound1, bound1)
    b1 = jax.random.uniform(k2, (9,), jnp.float32, -bound1, bound1)
    w2 = jax.random.uniform(k3, (9, 1), jnp.float32, -bound2, bound2)
    b2 = jax.random.uniform(k4, (1,), jnp.float32, -bound2, bound2)
    return w1, b1, w2, b2


def reference_forward(x, w1, b1, w2, b2):
    h = jnp.maximum(x @ w1 + b1, 0.0)
    return h @ w2 + b2


if __name__ == "__main__":
    key = jax.random.PRNGKey(0)
    k_params, k_x1, k_x2 = jax.random.split(key, 3)
    w1, b1, w2, b2 = init_params(k_params)

    # 1) Small f32 batch (single tile), exact parity.
    x_small = jax.random.normal(k_x1, (8, 3), jnp.float32)
    y_small = jax.block_until_ready(bpnn_forward(x_small, w1, b1, w2, b2))
    y_ref_small = reference_forward(x_small, w1, b1, w2, b2)
    assert y_small.shape == (8, 1), y_small.shape
    assert jnp.allclose(y_small, y_ref_small, atol=1e-5, rtol=1e-5)

    # 2) Multi-tile f32 batch with default tile_rows: exercises padding, the
    #    >=2-step cap (grid is at least 2, "parallel" batch axis), index_map.
    x_big = jax.random.normal(k_x2, (2000, 3), jnp.float32)
    y_big = jax.block_until_ready(bpnn_forward(x_big, w1, b1, w2, b2))
    y_ref_big = reference_forward(x_big, w1, b1, w2, b2)
    assert y_big.shape == (2000, 1), y_big.shape
    assert jnp.allclose(y_big, y_ref_big, atol=1e-5, rtol=1e-5)

    # 3) Pre-blocked fast path (no wrapper transpose) — the recommended way
    #    to call this kernel when the producer can emit [3, rows, 128].
    n = x_big.shape[0]
    rows = -(-n // _LANES)
    n_pad = rows * _LANES
    x3 = jnp.pad(x_big.T, ((0, 0), (0, n_pad - n))).reshape(_IN, rows, _LANES)
    y_blk = jax.block_until_ready(bpnn_forward_blocked(x3, w1, b1, w2, b2))
    y_blk = y_blk.reshape(-1)[:n].reshape(n, 1)
    assert jnp.allclose(y_blk, y_ref_big, atol=1e-5, rtol=1e-5)

    # 4) bf16 I/O path (f32 math in-kernel): halves HBM bytes where the
    #    kernel is memory-bound (v5e); looser tolerance vs the f32 reference.
    x_bf16 = x_big.astype(jnp.bfloat16)
    y_bf16 = jax.block_until_ready(bpnn_forward(x_bf16, w1, b1, w2, b2))
    y_ref_bf16 = reference_forward(x_bf16.astype(jnp.float32), w1, b1, w2, b2)
    assert y_bf16.dtype == jnp.bfloat16
    assert jnp.allclose(y_bf16.astype(jnp.float32), y_ref_bf16,
                        atol=3e-2, rtol=3e-2)

    print("KERNEL_OK")
</pallas_src>

<mosaic_0001>
module attributes {stable_mosaic.version = 11 : i64} {
  func.func @bpnn_kernel(%arg0: i32, %arg1: memref<27xf32, #tpu.memory_space<smem>>, %arg2: memref<9xf32, #tpu.memory_space<smem>>, %arg3: memref<9xf32, #tpu.memory_space<smem>>, %arg4: memref<1xf32, #tpu.memory_space<smem>>, %arg5: memref<3x8x128xf32, #tpu.memory_space<vmem>>, %arg6: memref<8x128xf32, #tpu.memory_space<vmem>>) attributes {dimension_semantics = [#tpu.dimension_semantics<parallel>], iteration_bounds = array<i64: 1>, scalar_prefetch = 4 : i64, scratch_operands = 0 : i64, tpu.core_type = #tpu.core_type<tc>, window_params = [{transform_indices = @transform_0, window_bounds = array<i64: 3, 8, 128>}, {transform_indices = @transform_1, window_bounds = array<i64: 8, 128>}]} {
    %c0 = arith.constant 0 : index
    %c0_0 = arith.constant 0 : index
    %c0_1 = arith.constant 0 : index
    %0 = vector.load %arg5[%c0, %c0_0, %c0_1] : memref<3x8x128xf32, #tpu.memory_space<vmem>>, vector<1x8x128xf32>
    %1 = vector.shape_cast %0 : vector<1x8x128xf32> to vector<8x128xf32>
    %c1 = arith.constant 1 : index
    %c0_2 = arith.constant 0 : index
    %c0_3 = arith.constant 0 : index
    %2 = vector.load %arg5[%c1, %c0_2, %c0_3] : memref<3x8x128xf32, #tpu.memory_space<vmem>>, vector<1x8x128xf32>
    %3 = vector.shape_cast %2 : vector<1x8x128xf32> to vector<8x128xf32>
    %c2 = arith.constant 2 : index
    %c0_4 = arith.constant 0 : index
    %c0_5 = arith.constant 0 : index
    %4 = vector.load %arg5[%c2, %c0_4, %c0_5] : memref<3x8x128xf32, #tpu.memory_space<vmem>>, vector<1x8x128xf32>
    %5 = vector.shape_cast %4 : vector<1x8x128xf32> to vector<8x128xf32>
    %c0_6 = arith.constant 0 : index
    %6 = memref.load %arg1[%c0_6] : memref<27xf32, #tpu.memory_space<smem>>
    %7 = vector.broadcast %6 : f32 to vector<8x128xf32>
    %8 = arith.mulf %1, %7 : vector<8x128xf32>
    %c0_7 = arith.constant 0 : index
    %9 = memref.load %arg2[%c0_7] : memref<9xf32, #tpu.memory_space<smem>>
    %10 = vector.broadcast %9 : f32 to vector<8x128xf32>
    %11 = arith.addf %8, %10 : vector<8x128xf32>
    %c9 = arith.constant 9 : index
    %12 = memref.load %arg1[%c9] : memref<27xf32, #tpu.memory_space<smem>>
    %13 = vector.broadcast %12 : f32 to vector<8x128xf32>
    %14 = arith.mulf %3, %13 : vector<8x128xf32>
    %15 = arith.addf %14, %11 : vector<8x128xf32>
    %c18 = arith.constant 18 : index
    %16 = memref.load %arg1[%c18] : memref<27xf32, #tpu.memory_space<smem>>
    %17 = vector.broadcast %16 : f32 to vector<8x128xf32>
    %18 = arith.mulf %5, %17 : vector<8x128xf32>
    %19 = arith.addf %18, %15 : vector<8x128xf32>
    %cst = arith.constant 0.000000e+00 : f32
    %20 = vector.broadcast %cst : f32 to vector<8x128xf32>
    %21 = arith.maximumf %19, %20 : vector<8x128xf32>
    %c0_8 = arith.constant 0 : index
    %22 = memref.load %arg3[%c0_8] : memref<9xf32, #tpu.memory_space<smem>>
    %23 = vector.broadcast %22 : f32 to vector<8x128xf32>
    %24 = arith.mulf %21, %23 : vector<8x128xf32>
    %c0_9 = arith.constant 0 : index
    %25 = memref.load %arg4[%c0_9] : memref<1xf32, #tpu.memory_space<smem>>
    %26 = vector.broadcast %25 : f32 to vector<8x128xf32>
    %27 = arith.addf %24, %26 : vector<8x128xf32>
    %c1_10 = arith.constant 1 : index
    %28 = memref.load %arg1[%c1_10] : memref<27xf32, #tpu.memory_space<smem>>
    %29 = vector.broadcast %28 : f32 to vector<8x128xf32>
    %30 = arith.mulf %1, %29 : vector<8x128xf32>
    %c1_11 = arith.constant 1 : index
    %31 = memref.load %arg2[%c1_11] : memref<9xf32, #tpu.memory_space<smem>>
    %32 = vector.broadcast %31 : f32 to vector<8x128xf32>
    %33 = arith.addf %30, %32 : vector<8x128xf32>
    %c10 = arith.constant 10 : index
    %34 = memref.load %arg1[%c10] : memref<27xf32, #tpu.memory_space<smem>>
    %35 = vector.broadcast %34 : f32 to vector<8x128xf32>
    %36 = arith.mulf %3, %35 : vector<8x128xf32>
    %37 = arith.addf %36, %33 : vector<8x128xf32>
    %c19 = arith.constant 19 : index
    %38 = memref.load %arg1[%c19] : memref<27xf32, #tpu.memory_space<smem>>
    %39 = vector.broadcast %38 : f32 to vector<8x128xf32>
    %40 = arith.mulf %5, %39 : vector<8x128xf32>
    %41 = arith.addf %40, %37 : vector<8x128xf32>
    %cst_12 = arith.constant 0.000000e+00 : f32
    %42 = vector.broadcast %cst_12 : f32 to vector<8x128xf32>
    %43 = arith.maximumf %41, %42 : vector<8x128xf32>
    %c1_13 = arith.constant 1 : index
    %44 = memref.load %arg3[%c1_13] : memref<9xf32, #tpu.memory_space<smem>>
    %45 = vector.broadcast %44 : f32 to vector<8x128xf32>
    %46 = arith.mulf %43, %45 : vector<8x128xf32>
    %47 = arith.addf %46, %27 : vector<8x128xf32>
    %c2_14 = arith.constant 2 : index
    %48 = memref.load %arg1[%c2_14] : memref<27xf32, #tpu.memory_space<smem>>
    %49 = vector.broadcast %48 : f32 to vector<8x128xf32>
    %50 = arith.mulf %1, %49 : vector<8x128xf32>
    %c2_15 = arith.constant 2 : index
    %51 = memref.load %arg2[%c2_15] : memref<9xf32, #tpu.memory_space<smem>>
    %52 = vector.broadcast %51 : f32 to vector<8x128xf32>
    %53 = arith.addf %50, %52 : vector<8x128xf32>
    %c11 = arith.constant 11 : index
    %54 = memref.load %arg1[%c11] : memref<27xf32, #tpu.memory_space<smem>>
    %55 = vector.broadcast %54 : f32 to vector<8x128xf32>
    %56 = arith.mulf %3, %55 : vector<8x128xf32>
    %57 = arith.addf %56, %53 : vector<8x128xf32>
    %c20 = arith.constant 20 : index
    %58 = memref.load %arg1[%c20] : memref<27xf32, #tpu.memory_space<smem>>
    %59 = vector.broadcast %58 : f32 to vector<8x128xf32>
    %60 = arith.mulf %5, %59 : vector<8x128xf32>
    %61 = arith.addf %60, %57 : vector<8x128xf32>
    %cst_16 = arith.constant 0.000000e+00 : f32
    %62 = vector.broadcast %cst_16 : f32 to vector<8x128xf32>
    %63 = arith.maximumf %61, %62 : vector<8x128xf32>
    %c2_17 = arith.constant 2 : index
    %64 = memref.load %arg3[%c2_17] : memref<9xf32, #tpu.memory_space<smem>>
    %65 = vector.broadcast %64 : f32 to vector<8x128xf32>
    %66 = arith.mulf %63, %65 : vector<8x128xf32>
    %67 = arith.addf %66, %47 : vector<8x128xf32>
    %c3 = arith.constant 3 : index
    %68 = memref.load %arg1[%c3] : memref<27xf32, #tpu.memory_space<smem>>
    %69 = vector.broadcast %68 : f32 to vector<8x128xf32>
    %70 = arith.mulf %1, %69 : vector<8x128xf32>
    %c3_18 = arith.constant 3 : index
    %71 = memref.load %arg2[%c3_18] : memref<9xf32, #tpu.memory_space<smem>>
    %72 = vector.broadcast %71 : f32 to vector<8x128xf32>
    %73 = arith.addf %70, %72 : vector<8x128xf32>
    %c12 = arith.constant 12 : index
    %74 = memref.load %arg1[%c12] : memref<27xf32, #tpu.memory_space<smem>>
    %75 = vector.broadcast %74 : f32 to vector<8x128xf32>
    %76 = arith.mulf %3, %75 : vector<8x128xf32>
    %77 = arith.addf %76, %73 : vector<8x128xf32>
    %c21 = arith.constant 21 : index
    %78 = memref.load %arg1[%c21] : memref<27xf32, #tpu.memory_space<smem>>
    %79 = vector.broadcast %78 : f32 to vector<8x128xf32>
    %80 = arith.mulf %5, %79 : vector<8x128xf32>
    %81 = arith.addf %80, %77 : vector<8x128xf32>
    %cst_19 = arith.constant 0.000000e+00 : f32
    %82 = vector.broadcast %cst_19 : f32 to vector<8x128xf32>
    %83 = arith.maximumf %81, %82 : vector<8x128xf32>
    %c3_20 = arith.constant 3 : index
    %84 = memref.load %arg3[%c3_20] : memref<9xf32, #tpu.memory_space<smem>>
    %85 = vector.broadcast %84 : f32 to vector<8x128xf32>
    %86 = arith.mulf %83, %85 : vector<8x128xf32>
    %87 = arith.addf %86, %67 : vector<8x128xf32>
    %c4 = arith.constant 4 : index
    %88 = memref.load %arg1[%c4] : memref<27xf32, #tpu.memory_space<smem>>
    %89 = vector.broadcast %88 : f32 to vector<8x128xf32>
    %90 = arith.mulf %1, %89 : vector<8x128xf32>
    %c4_21 = arith.constant 4 : index
    %91 = memref.load %arg2[%c4_21] : memref<9xf32, #tpu.memory_space<smem>>
    %92 = vector.broadcast %91 : f32 to vector<8x128xf32>
    %93 = arith.addf %90, %92 : vector<8x128xf32>
    %c13 = arith.constant 13 : index
    %94 = memref.load %arg1[%c13] : memref<27xf32, #tpu.memory_space<smem>>
    %95 = vector.broadcast %94 : f32 to vector<8x128xf32>
    %96 = arith.mulf %3, %95 : vector<8x128xf32>
    %97 = arith.addf %96, %93 : vector<8x128xf32>
    %c22 = arith.constant 22 : index
    %98 = memref.load %arg1[%c22] : memref<27xf32, #tpu.memory_space<smem>>
    %99 = vector.broadcast %98 : f32 to vector<8x128xf32>
    %100 = arith.mulf %5, %99 : vector<8x128xf32>
    %101 = arith.addf %100, %97 : vector<8x128xf32>
    %cst_22 = arith.constant 0.000000e+00 : f32
    %102 = vector.broadcast %cst_22 : f32 to vector<8x128xf32>
    %103 = arith.maximumf %101, %102 : vector<8x128xf32>
    %c4_23 = arith.constant 4 : index
    %104 = memref.load %arg3[%c4_23] : memref<9xf32, #tpu.memory_space<smem>>
    %105 = vector.broadcast %104 : f32 to vector<8x128xf32>
    %106 = arith.mulf %103, %105 : vector<8x128xf32>
    %107 = arith.addf %106, %87 : vector<8x128xf32>
    %c5 = arith.constant 5 : index
    %108 = memref.load %arg1[%c5] : memref<27xf32, #tpu.memory_space<smem>>
    %109 = vector.broadcast %108 : f32 to vector<8x128xf32>
    %110 = arith.mulf %1, %109 : vector<8x128xf32>
    %c5_24 = arith.constant 5 : index
    %111 = memref.load %arg2[%c5_24] : memref<9xf32, #tpu.memory_space<smem>>
    %112 = vector.broadcast %111 : f32 to vector<8x128xf32>
    %113 = arith.addf %110, %112 : vector<8x128xf32>
    %c14 = arith.constant 14 : index
    %114 = memref.load %arg1[%c14] : memref<27xf32, #tpu.memory_space<smem>>
    %115 = vector.broadcast %114 : f32 to vector<8x128xf32>
    %116 = arith.mulf %3, %115 : vector<8x128xf32>
    %117 = arith.addf %116, %113 : vector<8x128xf32>
    %c23 = arith.constant 23 : index
    %118 = memref.load %arg1[%c23] : memref<27xf32, #tpu.memory_space<smem>>
    %119 = vector.broadcast %118 : f32 to vector<8x128xf32>
    %120 = arith.mulf %5, %119 : vector<8x128xf32>
    %121 = arith.addf %120, %117 : vector<8x128xf32>
    %cst_25 = arith.constant 0.000000e+00 : f32
    %122 = vector.broadcast %cst_25 : f32 to vector<8x128xf32>
    %123 = arith.maximumf %121, %122 : vector<8x128xf32>
    %c5_26 = arith.constant 5 : index
    %124 = memref.load %arg3[%c5_26] : memref<9xf32, #tpu.memory_space<smem>>
    %125 = vector.broadcast %124 : f32 to vector<8x128xf32>
    %126 = arith.mulf %123, %125 : vector<8x128xf32>
    %127 = arith.addf %126, %107 : vector<8x128xf32>
    %c6 = arith.constant 6 : index
    %128 = memref.load %arg1[%c6] : memref<27xf32, #tpu.memory_space<smem>>
    %129 = vector.broadcast %128 : f32 to vector<8x128xf32>
    %130 = arith.mulf %1, %129 : vector<8x128xf32>
    %c6_27 = arith.constant 6 : index
    %131 = memref.load %arg2[%c6_27] : memref<9xf32, #tpu.memory_space<smem>>
    %132 = vector.broadcast %131 : f32 to vector<8x128xf32>
    %133 = arith.addf %130, %132 : vector<8x128xf32>
    %c15 = arith.constant 15 : index
    %134 = memref.load %arg1[%c15] : memref<27xf32, #tpu.memory_space<smem>>
    %135 = vector.broadcast %134 : f32 to vector<8x128xf32>
    %136 = arith.mulf %3, %135 : vector<8x128xf32>
    %137 = arith.addf %136, %133 : vector<8x128xf32>
    %c24 = arith.constant 24 : index
    %138 = memref.load %arg1[%c24] : memref<27xf32, #tpu.memory_space<smem>>
    %139 = vector.broadcast %138 : f32 to vector<8x128xf32>
    %140 = arith.mulf %5, %139 : vector<8x128xf32>
    %141 = arith.addf %140, %137 : vector<8x128xf32>
    %cst_28 = arith.constant 0.000000e+00 : f32
    %142 = vector.broadcast %cst_28 : f32 to vector<8x128xf32>
    %143 = arith.maximumf %141, %142 : vector<8x128xf32>
    %c6_29 = arith.constant 6 : index
    %144 = memref.load %arg3[%c6_29] : memref<9xf32, #tpu.memory_space<smem>>
    %145 = vector.broadcast %144 : f32 to vector<8x128xf32>
    %146 = arith.mulf %143, %145 : vector<8x128xf32>
    %147 = arith.addf %146, %127 : vector<8x128xf32>
    %c7 = arith.constant 7 : index
    %148 = memref.load %arg1[%c7] : memref<27xf32, #tpu.memory_space<smem>>
    %149 = vector.broadcast %148 : f32 to vector<8x128xf32>
    %150 = arith.mulf %1, %149 : vector<8x128xf32>
    %c7_30 = arith.constant 7 : index
    %151 = memref.load %arg2[%c7_30] : memref<9xf32, #tpu.memory_space<smem>>
    %152 = vector.broadcast %151 : f32 to vector<8x128xf32>
    %153 = arith.addf %150, %152 : vector<8x128xf32>
    %c16 = arith.constant 16 : index
    %154 = memref.load %arg1[%c16] : memref<27xf32, #tpu.memory_space<smem>>
    %155 = vector.broadcast %154 : f32 to vector<8x128xf32>
    %156 = arith.mulf %3, %155 : vector<8x128xf32>
    %157 = arith.addf %156, %153 : vector<8x128xf32>
    %c25 = arith.constant 25 : index
    %158 = memref.load %arg1[%c25] : memref<27xf32, #tpu.memory_space<smem>>
    %159 = vector.broadcast %158 : f32 to vector<8x128xf32>
    %160 = arith.mulf %5, %159 : vector<8x128xf32>
    %161 = arith.addf %160, %157 : vector<8x128xf32>
    %cst_31 = arith.constant 0.000000e+00 : f32
    %162 = vector.broadcast %cst_31 : f32 to vector<8x128xf32>
    %163 = arith.maximumf %161, %162 : vector<8x128xf32>
    %c7_32 = arith.constant 7 : index
    %164 = memref.load %arg3[%c7_32] : memref<9xf32, #tpu.memory_space<smem>>
    %165 = vector.broadcast %164 : f32 to vector<8x128xf32>
    %166 = arith.mulf %163, %165 : vector<8x128xf32>
    %167 = arith.addf %166, %147 : vector<8x128xf32>
    %c8 = arith.constant 8 : index
    %168 = memref.load %arg1[%c8] : memref<27xf32, #tpu.memory_space<smem>>
    %169 = vector.broadcast %168 : f32 to vector<8x128xf32>
    %170 = arith.mulf %1, %169 : vector<8x128xf32>
    %c8_33 = arith.constant 8 : index
    %171 = memref.load %arg2[%c8_33] : memref<9xf32, #tpu.memory_space<smem>>
    %172 = vector.broadcast %171 : f32 to vector<8x128xf32>
    %173 = arith.addf %170, %172 : vector<8x128xf32>
    %c17 = arith.constant 17 : index
    %174 = memref.load %arg1[%c17] : memref<27xf32, #tpu.memory_space<smem>>
    %175 = vector.broadcast %174 : f32 to vector<8x128xf32>
    %176 = arith.mulf %3, %175 : vector<8x128xf32>
    %177 = arith.addf %176, %173 : vector<8x128xf32>
    %c26 = arith.constant 26 : index
    %178 = memref.load %arg1[%c26] : memref<27xf32, #tpu.memory_space<smem>>
    %179 = vector.broadcast %178 : f32 to vector<8x128xf32>
    %180 = arith.mulf %5, %179 : vector<8x128xf32>
    %181 = arith.addf %180, %177 : vector<8x128xf32>
    %cst_34 = arith.constant 0.000000e+00 : f32
    %182 = vector.broadcast %cst_34 : f32 to vector<8x128xf32>
    %183 = arith.maximumf %181, %182 : vector<8x128xf32>
    %c8_35 = arith.constant 8 : index
    %184 = memref.load %arg3[%c8_35] : memref<9xf32, #tpu.memory_space<smem>>
    %185 = vector.broadcast %184 : f32 to vector<8x128xf32>
    %186 = arith.mulf %183, %185 : vector<8x128xf32>
    %187 = arith.addf %186, %167 : vector<8x128xf32>
    %c0_36 = arith.constant 0 : index
    %c0_37 = arith.constant 0 : index
    %188 = vector.load %arg6[%c0_36, %c0_37] : memref<8x128xf32, #tpu.memory_space<vmem>>, vector<8x128xf32>
    tpu.vector_store %arg6[%c0_36, %c0_37], %187 {strides = array<i32>} : memref<8x128xf32, #tpu.memory_space<vmem>>, vector<8x128xf32>,
    return
  }
  func.func @transform_0(%arg0: i32, %arg1: memref<27xf32, #tpu.memory_space<smem>>, %arg2: memref<9xf32, #tpu.memory_space<smem>>, %arg3: memref<9xf32, #tpu.memory_space<smem>>, %arg4: memref<1xf32, #tpu.memory_space<smem>>) -> (i32, i32, i32) {
    %c0_i32 = arith.constant 0 : i32
    %c0_i32_0 = arith.constant 0 : i32
    %c0_i32_1 = arith.constant 0 : i32
    return %c0_i32, %arg0, %c0_i32_0 : i32, i32, i32
  }
  func.func @transform_1(%arg0: i32, %arg1: memref<27xf32, #tpu.memory_space<smem>>, %arg2: memref<9xf32, #tpu.memory_space<smem>>, %arg3: memref<9xf32, #tpu.memory_space<smem>>, %arg4: memref<1xf32, #tpu.memory_space<smem>>) -> (i32, i32) {
    %c0_i32 = arith.constant 0 : i32
    %c0_i32_0 = arith.constant 0 : i32
    return %arg0, %c0_i32 : i32, i32
  }
}

</mosaic_0001>

<bundles_post_ra>
// kernel: tpu_custom_call.1
= control target key start
LH: loop header
LB: loop body
LE: loop exit
PB: predicated region body
PF: predicated region fallthrough
CT: control target
= control target key end

     0   :  { %s479_s0 = inlined_call_operand.vmem [shape: f32[27], index: 0, kind: input, shape index: {}]   ;;  %s480_s3 = inlined_call_operand.<no memory space> [shape: f32[1], index: 3, kind: input, shape index: {}]   ;;  %s481_s4 = inlined_call_operand.hbm [shape: f32[3,8,128], index: 4, kind: input, shape index: {}]   ;;  %s482_s5 = inlined_call_operand.hbm [shape: f32[8,128], index: 5, kind: output, shape index: {}]   ;;  %s483_s1 = inlined_call_operand.vmem [shape: f32[9], index: 1, kind: input, shape index: {}]   ;;  %s484_s2 = inlined_call_operand.vmem [shape: f32[9], index: 2, kind: input, shape index: {}]  }
   0x1   :  { %s10_s20 = sshll.u32 %s479_s0, 4  ;;  %s14_s23 = sshll.u32 %s483_s1, 4  ;;  %s11_s20 = int_to_ptr.vmem [resolvable:$true] %s10_s20  ;;  %s15_s23 = int_to_ptr.vmem [resolvable:$true] %s14_s23 }
   0x2   :  { %s285_s24 = scalar_lea.vmem %s11_s20, 16  ;;  %p290_p1 = scmp.lt.s32.totalorder %s11_s20, %s11_s20 }
   0x3   :  { %p286_p0 = scmp.ne.s32.totalorder %s11_s20, %s285_s24  ;;  %p291_p2 = scmp.lt.s32.totalorder %s285_s24, %s285_s24 }
   0x5   :  { %p292_p3 = por %p291_p2, %p290_p1 }
   0x7   :  { %p293_p4 = pnand %p292_p3, %p286_p0 }
   0x9   :  { %296 = shalt.err (!%p293_p4)  }
   0xa   :  { %s367_s25 = smov [#allocation3]   ;;  %s297_s26 = scalar_lea.vmem %s15_s23, 16 }
   0xb   :  { %13 = dma.vmem_to_smem %s11_s20, 16, %s367_s25, [#allocation2] }
   0xc   :  { %p298_p5 = scmp.ne.s32.totalorder %s15_s23, %s297_s26  ;;  %p302_p6 = scmp.lt.s32.totalorder %s15_s23, %s15_s23 }
   0xd   :  { %p303_p7 = scmp.lt.s32.totalorder %s297_s26, %s297_s26 }
   0xf   :  { %p304_p8 = por %p303_p7, %p302_p6 }
  0x11   :  { %p305_p9 = pnand %p304_p8, %p298_p5 }
  0x13   :  { %308 = shalt.err (!%p305_p9)  }
  0x14   :  { %s368_s0 = smov [#allocation4]   ;;  %s18_s28 = sshll.u32 %s484_s2, 4  ;;  %s19_s28 = int_to_ptr.vmem [resolvable:$true] %s18_s28 }
  0x15   :  { %17 = dma.vmem_to_smem %s15_s23, 16, %s368_s0, [#allocation2] }
  0x16   :  { %s309_s29 = scalar_lea.vmem %s19_s28, 16  ;;  %p314_p11 = scmp.lt.s32.totalorder %s19_s28, %s19_s28 }
  0x17   :  { %p310_p10 = scmp.ne.s32.totalorder %s19_s28, %s309_s29  ;;  %p315_p12 = scmp.lt.s32.totalorder %s309_s29, %s309_s29 }
  0x19   :  { %p316_p13 = por %p315_p12, %p314_p11 }
  0x1b   :  { %p317_p0 = pnand %p316_p13, %p310_p10 }
  0x1d   :  { %320 = shalt.err (!%p317_p0)  }
  0x1e   :  { %s369_s30 = smov [#allocation5]  }
  0x1f   :  { %21 = dma.vmem_to_smem %s19_s28, 16, %s369_s30, [#allocation2] }
  0x20   :  { %361 = dma.done.wait [#allocation2], 48 }
  0x21   :  { %362 = vsyncadd [#allocation2], 4294967248 }
  0x22   :  { %24 = sfence }
  0x23   :  { %25 = vsyncpa [#allocation8], 0 }
  0x24   :  { %26 = vsyncpa [#allocation9], 0  ;;  %s370_s6 = smov [#allocation7]  }
  0x25   :  { %s32_s7 = sshll.u32 %s370_s6, 4  ;;  %s33_s7 = int_to_ptr.vmem [resolvable:$true] %s32_s7 }
  0x26   :  { %s329_s8 = scalar_lea.vmem %s33_s7, 384  ;;  %p334_p2 = scmp.lt.s32.totalorder %s33_s7, %s33_s7 }
  0x27   :  { %p330_p1 = scmp.ne.s32.totalorder %s33_s7, %s329_s8  ;;  %p335_p3 = scmp.lt.s32.totalorder %s329_s8, %s329_s8 }
  0x29   :  { %p336_p4 = por %p335_p3, %p334_p2 }
  0x2b   :  { %p337_p5 = pnand %p336_p4, %p330_p1 }
  0x2d   :  { %340 = shalt.err (!%p337_p5)
}
  0x2e   :  { %s371_s2 = smov 128   ;;  %s372_s9 = smov 8  }
  0x2f   :  { %38 = dma.hbm_to_vmem [thread:$0]  %s481_s4, 384, %s33_s7, [#allocation8], %s371_s2, %s371_s2, %s372_s9  }
  0x30   :  { %363 = dma.done.wait [#allocation8], 384  }
  0x31   :  { %364 = vsyncadd [#allocation8], 4294966912  ;;  %s47_s12 = sld [smem:[#allocation3]]  ;;  %v418_v0 = vld [vmem:[#allocation7] sm:$0xff]  ;;  %v420_v1 = vld [vmem:[#allocation7 + $0x8] sm:$0xff]  ;;  %v66_v33 = vstv %s480_s3 }
  0x32   :  { %s50_s13 = sld [smem:[#allocation4]]  ;;  %v422_v3 = vld [vmem:[#allocation7 + $0x10] sm:$0xff] }
  0x33   :  { %s236_s14 = sld [smem:[#allocation3 + $0x9]] }
  0x34   :  { %s237_s15 = sld [smem:[#allocation3 + $0x12]] }
  0x35   :  { %s416_s16 = sld [smem:[#allocation5]] }
  0x36   :  { %s238_s17 = sld [smem:[#allocation3 + $0x1]] }
  0x37   :  { %v48_v2 = vstv %s47_s12  ;;  %s239_s18 = sld [smem:[#allocation4 + $0x1]] }
  0x38   :  { %v49_v4 = vmul.f32 %v48_v2, %v418_v0  ;;  %v51_v5 = vstv %s50_s13  ;;  %s240_s4 = sld [smem:[#allocation3 + $0xa]] }
  0x39   :  { %v54_v6 = vstv %s236_s14  ;;  %s241_s19 = sld [smem:[#allocation3 + $0x13]] }
  0x3a   :  { %v52_v7 = vadd.f32 %v51_v5, %v49_v4  ;;  %v55_v8 = vmul.f32 %v54_v6, %v420_v1  ;;  %v58_v9 = vstv %s237_s15  ;;  %s426_s20 = sld [smem:[#allocation5 + $0x1]] }
  0x3b   :  { %v59_v10 = vmul.f32 %v58_v9, %v422_v3  ;;  %s243_s21 = sld [smem:[#allocation3 + $0x2]]  ;;  %v63_v22 = vstv %s416_s16 }
  0x3c   :  { %v56_v11 = vadd.f32 %v55_v8, %v52_v7  ;;  %v69_v12 = vstv %s238_s17  ;;  %s244_s22 = sld [smem:[#allocation4 + $0x2]] }
  0x3d   :  { %v70_v13 = vmul.f32 %v69_v12, %v418_v0  ;;  %v72_v14 = vstv %s239_s18  ;;  %s245_s23 = sld [smem:[#allocation3 + $0xb]] }
  0x3e   :  { %v60_v15 = vadd.f32 %v59_v10, %v56_v11  ;;  %v75_v16 = vstv %s240_s4  ;;  %s246_s24 = sld [smem:[#allocation3 + $0x14]] }
  0x3f   :  { %v73_v17 = vadd.f32 %v72_v14, %v70_v13  ;;  %v76_v18 = vmul.f32 %v75_v16, %v420_v1  ;;  %v79_v19 = vstv %s241_s19  ;;  %s431_s25 = sld [smem:[#allocation5 + $0x2]] }
  0x40   :  { %v61_v20 = vmax.f32 %v60_v15, 0.0  ;;  %v80_v21 = vmul.f32 %v79_v19, %v422_v3  ;;  %s248_s26 = sld [smem:[#allocation3 + $0x3]]  ;;  %v84_v36 = vstv %s426_s20 }
  0x41   :  { %v77_v23 = vadd.f32 %v76_v18, %v73_v17  ;;  %v88_v24 = vstv %s243_s21  ;;  %s249_s0 = sld [smem:[#allocation4 + $0x3]] }
  0x42   :  { %v89_v25 = vmul.f32 %v88_v24, %v418_v0  ;;  %v91_v26 = vstv %s244_s22  ;;  %s250_s1 = sld [smem:[#allocation3 + $0xc]]  ;;  %v64_v29 = vmul.f32 %v63_v22, %v61_v20 }
  0x43   :  { %v81_v27 = vadd.f32 %v80_v21, %v77_v23  ;;  %v94_v28 = vstv %s245_s23  ;;  %s251_s27 = sld [smem:[#allocation3 + $0x15]] }
  0x44   :  { %v92_v30 = vadd.f32 %v91_v26, %v89_v25  ;;  %v95_v31 = vmul.f32 %v94_v28, %v420_v1  ;;  %v98_v32 = vstv %s246_s24  ;;  %s437_s28 = sld [smem:[#allocation5 + $0x3]]  ;;  %v67_v41 = vadd.f32 %v66_v33, %v64_v29 }
  0x45   :  { %v82_v34 = vmax.f32 %v81_v27, 0.0  ;;  %v99_v35 = vmul.f32 %v98_v32, %v422_v3  ;;  %s253_s6 = sld [smem:[#allocation3 + $0x4]]  ;;  %v103_v50 = vstv %s431_s25 }
  0x46   :  { %v96_v37 = vadd.f32 %v95_v31, %v92_v30  ;;  %v107_v38 = vstv %s248_s26  ;;  %s254_s7 = sld [smem:[#allocation4 + $0x4]] }
  0x47   :  { %v108_v39 = vmul.f32 %v107_v38, %v418_v0  ;;  %v110_v40 = vstv %s249_s0  ;;  %s255_s8 = sld [smem:[#allocation3 + $0xd]]  ;;  %v85_v44 = vmul.f32 %v84_v36, %v82_v34 }
  0x48   :  { %v100_v42 = vadd.f32 %v99_v35, %v96_v37  ;;  %v113_v43 = vstv %s250_s1  ;;  %s256_s2 = sld [smem:[#allocation3 + $0x16]]  ;;  %s373_s1 = smov [#allocation10]  }
  0x49   :  { %v111_v45 = vadd.f32 %v110_v40, %v108_v39  ;;  %v114_v46 = vmul.f32 %v113_v43, %v420_v1  ;;  %v117_v47 = vstv %s251_s27  ;;  %s446_s3 = sld [smem:[#allocation5 + $0x4]]  ;;  %v86_v55 = vadd.f32 %v85_v44, %v67_v41  ;;  %s227_s27 = sshll.u32 %s373_s1, 4  ;;  %s228_s27 = int_to_ptr.vmem [resolvable:$true] %s227_s27 }
  0x4a   :  { %v101_v48 = vmax.f32 %v100_v42, 0.0  ;;  %v118_v49 = vmul.f32 %v117_v47, %v422_v3  ;;  %s258_s9 = sld [smem:[#allocation3 + $0x5]]  ;;  %v122_v2 = vstv %s437_s28  ;;  %s341_s28 = scalar_lea.vmem %s228_s27, 128 }
  0x4b   :  { %v115_v51 = vadd.f32 %v114_v46, %v111_v45  ;;  %v126_v52 = vstv %s253_s6  ;;  %s259_s10 = sld [smem:[#allocation4 + $0x5]]  ;;  %p342_p6 = scmp.ne.s32.totalorder %s228_s27, %s341_s28 }
  0x4c   :  { %v127_v53 = vmul.f32 %v126_v52, %v418_v0  ;;  %v129_v54 = vstv %s254_s7  ;;  %s260_s11 = sld [smem:[#allocation3 + $0xe]]  ;;  %v104_v58 = vmul.f32 %v103_v50, %v101_v48  ;;  %p346_p7 = scmp.lt.s32.totalorder %s228_s27, %s228_s27 }
  0x4d   :  { %v119_v56 = vadd.f32 %v118_v49, %v115_v51  ;;  %v132_v57 = vstv %s255_s8  ;;  %s261_s12 = sld [smem:[#allocation3 + $0x17]]  ;;  %p347_p8 = scmp.lt.s32.totalorder %s341_s28, %s341_s28 }
  0x4e   :  { %v130_v59 = vadd.f32 %v129_v54, %v127_v53  ;;  %v133_v60 = vmul.f32 %v132_v57, %v420_v1  ;;  %v136_v61 = vstv %s256_s2  ;;  %s452_s13 = sld [smem:[#allocation5 + $0x5]]  ;;  %v105_v8 = vadd.f32 %v104_v58, %v86_v55 }
  0x4f   :  { %v120_v62 = vmax.f32 %v119_v56, 0.0  ;;  %v137_v63 = vmul.f32 %v136_v61, %v422_v3  ;;  %s263_s14 = sld [smem:[#allocation3 + $0x6]]  ;;  %v141_v17 = vstv %s446_s3  ;;  %p348_p9 = por %p347_p8, %p346_p7 }
  0x50   :  { %v134_v4 = vadd.f32 %v133_v60, %v130_v59  ;;  %v145_v5 = vstv %s258_s9  ;;  %s264_s15 = sld [smem:[#allocation4 + $0x6]] }
  0x51   :  { %v146_v6 = vmul.f32 %v145_v5, %v418_v0  ;;  %v148_v7 = vstv %s259_s10  ;;  %s265_s16 = sld [smem:[#allocation3 + $0xf]]  ;;  %v123_v11 = vmul.f32 %v122_v2, %v120_v62  ;;  %p349_p10 = pnand %p348_p9, %p342_p6 }
  0x52   :  { %v138_v9 = vadd.f32 %v137_v63, %v134_v4  ;;  %v151_v10 = vstv %s260_s11  ;;  %s266_s17 = sld [smem:[#allocation3 + $0x18]] }
  0x53   :  { %v149_v12 = vadd.f32 %v148_v7, %v146_v6  ;;  %v152_v13 = vmul.f32 %v151_v10, %v420_v1  ;;  %v155_v14 = vstv %s261_s12  ;;  %s458_s18 = sld [smem:[#allocation5 + $0x6]]  ;;  %v124_v22 = vadd.f32 %v123_v11, %v105_v8 }
  0x54   :  { %v139_v15 = vmax.f32 %v138_v9, 0.0  ;;  %v156_v16 = vmul.f32 %v155_v14, %v422_v3  ;;  %s268_s4 = sld [smem:[#allocation3 + $0x7]]  ;;  %v160_v30 = vstv %s452_s13 }
  0x55   :  { %v153_v18 = vadd.f32 %v152_v13, %v149_v12  ;;  %v164_v19 = vstv %s263_s14  ;;  %s269_s19 = sld [smem:[#allocation4 + $0x7]] }
  0x56   :  { %v165_v20 = vmul.f32 %v164_v19, %v418_v0  ;;  %v167_v21 = vstv %s264_s15  ;;  %s270_s20 = sld [smem:[#allocation3 + $0x10]]  ;;  %v142_v25 = vmul.f32 %v141_v17, %v139_v15 }
  0x57   :  { %v157_v23 = vadd.f32 %v156_v16, %v153_v18  ;;  %v170_v24 = vstv %s265_s16  ;;  %s271_s21 = sld [smem:[#allocation3 + $0x19]] }
  0x58   :  { %v168_v26 = vadd.f32 %v167_v21, %v165_v20  ;;  %v171_v27 = vmul.f32 %v170_v24, %v420_v1  ;;  %v174_v28 = vstv %s266_s17  ;;  %s464_s22 = sld [smem:[#allocation5 + $0x7]]  ;;  %v143_v36 = vadd.f32 %v142_v25, %v124_v22 }
  0x59   :  { %v158_v29 = vmax.f32 %v157_v23, 0.0  ;;  %v175_v31 = vmul.f32 %v174_v28, %v422_v3  ;;  %s273_s23 = sld [smem:[#allocation3 + $0x8]]  ;;  %v179_v40 = vstv %s458_s18 }
  0x5a   :  { %v172_v32 = vadd.f32 %v171_v27, %v168_v26  ;;  %v183_v33 = vstv %s268_s4  ;;  %s274_s24 = sld [smem:[#allocation4 + $0x8]] }
  0x5b   :  { %v184_v34 = vmul.f32 %v183_v33, %v418_v0  ;;  %v186_v35 = vstv %s269_s19  ;;  %s275_s25 = sld [smem:[#allocation3 + $0x11]]  ;;  %v161_v37 = vmul.f32 %v160_v30, %v158_v29 }
  0x5c   :  { %v176_v38 = vadd.f32 %v175_v31, %v172_v32  ;;  %v189_v39 = vstv %s270_s20  ;;  %s276_s26 = sld [smem:[#allocation3 + $0x1a]] }
  0x5d   :  { %v187_v41 = vadd.f32 %v186_v35, %v184_v34  ;;  %v190_v42 = vmul.f32 %v189_v39, %v420_v1  ;;  %v193_v43 = vstv %s271_s21  ;;  %s277_s0 = sld [smem:[#allocation5 + $0x8]]  ;;  %v162_v48 = vadd.f32 %v161_v37, %v143_v36 }
  0x5e   :  { %v177_v44 = vmax.f32 %v176_v38, 0.0  ;;  %v194_v45 = vmul.f32 %v193_v43, %v422_v3  ;;  %v198_v54 = vstv %s464_s22 }
  0x5f   :  { %v191_v46 = vadd.f32 %v190_v42, %v187_v41  ;;  %v202_v47 = vstv %s273_s23 }
  0x60   :  { %v180_v49 = vmul.f32 %v179_v40, %v177_v44  ;;  %v203_v50 = vmul.f32 %v202_v47, %v418_v0  ;;  %v205_v51 = vstv %s274_s24 }
  0x61   :  { %v195_v52 = vadd.f32 %v194_v45, %v191_v46  ;;  %v208_v53 = vstv %s275_s25 }
  0x62   :  { %v206_v55 = vadd.f32 %v205_v51, %v203_v50  ;;  %v209_v56 = vmul.f32 %v208_v53, %v420_v1  ;;  %v212_v57 = vstv %s276_s26  ;;  %v181_v60 = vadd.f32 %v180_v49, %v162_v48 }
  0x63   :  { %v196_v58 = vmax.f32 %v195_v52, 0.0  ;;  %v213_v59 = vmul.f32 %v212_v57, %v422_v3  ;;  %v217_v2 = vstv %s277_s0 }
  0x64   :  { %v210_v61 = vadd.f32 %v209_v56, %v206_v55 }
  0x65   :  { %v199_v62 = vmul.f32 %v198_v54, %v196_v58 }
  0x66   :  { %v214_v63 = vadd.f32 %v213_v59, %v210_v61 }
  0x67   :  { %v200_v4 = vadd.f32 %v199_v62, %v181_v60 }
  0x68   :  { %v215_v5 = vmax.f32 %v214_v63, 0.0 }
  0x6a   :  { %v218_v0 = vmul.f32 %v217_v2, %v215_v5 }
  0x6c   :  { %v219_v6 = vadd.f32 %v218_v0, %v200_v4 }
  0x6e   :  { %220 = vst [vmem:[#allocation10] sm:$0xff] %v219_v6 }
  0x6f   :  { %352 = shalt.err (!%p349_p10)
}
  0x70   :  { %230 = dma.vmem_to_hbm [thread:$0]  %s228_s27, 128, %s482_s5, [#allocation9]  }
  0x71   :  { %365 = dma.done.wait [#allocation9], 128  }
  0x72   :  { %366 = vsyncadd [#allocation9], 4294967168 }
  0x73   :  { %234 = vsyncpa [#allocation8], 1 }
  0x74   :  { %235 = vsyncpa [#allocation9], 1 }

</bundles_post_ra>
